<compile_context>
chip_gen: v7x
topology: tpu7x:2x2x1
jax: 0.10.0
libtpu: 0.0.40
codegen_flags: <defaults>
</compile_context>

<pallas_src>
import jax
import jax.numpy as jnp
from jax.experimental import pallas as pl
from jax.experimental.pallas import tpu as pltpu


def _round_up(n: int, m: int) -> int:
    return ((n + m - 1) // m) * m


def actor_kernel(x_ref, w0_ref, b0_ref, w1_ref, b1_ref, w2_ref, b2_ref,
                 wh_ref, bh_ref, out_ref):
    """One batch tile of the Actor forward, entirely in VMEM.

    x_ref  : (TILE_B, D_in)
    w*_ref : (in, out) pre-transposed hidden weights; b*_ref : (1, out)
    wh_ref : (2, h_last) stacked head weights (row 0 = tanh, row 1 = sigmoid)
    bh_ref : (2, 1) stacked head biases
    out_ref: (2, TILE_B) lane-dense output (row 0 = tanh head, row 1 = sigmoid)
    """
    x = x_ref[...]

    # hidden layer 0: ReLU(x @ W0 + b0)
    h = jnp.dot(x, w0_ref[...], preferred_element_type=jnp.float32) + b0_ref[...]
    h = jnp.maximum(h, 0.0)

    # hidden layer 1
    h = jnp.dot(h, w1_ref[...], preferred_element_type=jnp.float32) + b1_ref[...]
    h = jnp.maximum(h, 0.0)

    # hidden layer 2
    h = jnp.dot(h, w2_ref[...], preferred_element_type=jnp.float32) + b2_ref[...]
    h = jnp.maximum(h, 0.0)

    # Heads computed transposed: (2, h_last) . (TILE_B, h_last)^T -> (2, TILE_B)
    # so the batch dimension lands on lanes (lane-dense store).
    zT = jax.lax.dot_general(
        wh_ref[...], h,
        dimension_numbers=(((1,), (1,)), ((), ())),
        preferred_element_type=jnp.float32) + bh_ref[...]

    # Row 0 -> tanh, row 1 -> sigmoid, via a single tanh evaluation:
    #   sigmoid(z) = 0.5 * (1 + tanh(z / 2))
    row = jax.lax.broadcasted_iota(jnp.int32, zT.shape, dimension=0)
    is_tanh = row == 0
    t = jnp.tanh(jnp.where(is_tanh, zT, 0.5 * zT))
    out_ref[...] = jnp.where(is_tanh, t, 0.5 * t + 0.5)


def actor_forward(x, params, *, max_tile_b: int = 512):
    """Batch-tiled pallas_call; returns (B, 2) matching the torch module."""
    (w0t, b0, w1t, b1, w2t, b2, wh, bh) = params
    B, d_in = x.shape

    # Tile is a multiple of 128 so the lane-dense (2, TILE_B) output block and
    # the (TILE_B, D_in) input block satisfy the (8, 128) tiling constraint.
    tile_b = min(max_tile_b, _round_up(B, 128))
    b_pad = _round_up(B, tile_b)
    if b_pad != B:
        x = jnp.pad(x, ((0, b_pad - B), (0, 0)))
    grid = (b_pad // tile_b,)

    def const_spec(shape):
        # Full-array block, same block every grid step -> stays VMEM-resident.
        return pl.BlockSpec(shape, lambda i: (0, 0))

    out_t = pl.pallas_call(
        actor_kernel,
        out_shape=jax.ShapeDtypeStruct((2, b_pad), jnp.float32),
        grid=grid,
        in_specs=[
            pl.BlockSpec((tile_b, d_in), lambda i: (i, 0)),   # x: tiled over batch
            const_spec(w0t.shape), const_spec(b0.shape),
            const_spec(w1t.shape), const_spec(b1.shape),
            const_spec(w2t.shape), const_spec(b2.shape),
            const_spec(wh.shape), const_spec(bh.shape),
        ],
        out_specs=pl.BlockSpec((2, tile_b), lambda i: (0, i)),
        compiler_params=pltpu.CompilerParams(
            dimension_semantics=("parallel",)),
    )(x, w0t, b0, w1t, b1, w2t, b2, wh, bh)

    # (2, b_pad) lane-dense slab -> (B, 2) module output (cheap XLA transpose).
    return out_t[:, :B].T


def init_actor_params(key, input_dimension, hidden_layers):
    """Deterministic synthetic parameters matching the module's shapes.

    Hidden weights are returned transposed to (in, out), biases as (1, out).
    The two 1-unit heads are stacked as a (2, h_last) matrix (torch layout)
    with a (2, 1) bias, row 0 = tanh head, row 1 = sigmoid head.
    """
    h0, h1, h2 = hidden_layers
    ks = jax.random.split(key, 10)

    def lin(kw, kb, fan_in, fan_out):
        # uniform(-1/sqrt(fan_in), 1/sqrt(fan_in)) like torch's default init
        bound = 1.0 / jnp.sqrt(jnp.float32(fan_in))
        w = jax.random.uniform(kw, (fan_in, fan_out), jnp.float32, -bound, bound)
        b = jax.random.uniform(kb, (1, fan_out), jnp.float32, -bound, bound)
        return w, b

    w0t, b0 = lin(ks[0], ks[1], input_dimension, h0)
    w1t, b1 = lin(ks[2], ks[3], h0, h1)
    w2t, b2 = lin(ks[4], ks[5], h1, h2)

    # heads (xavier_normal on weights in the original module)
    std = jnp.sqrt(2.0 / jnp.float32(h2 + 1))
    w_tanh = jax.random.normal(ks[6], (1, h2), jnp.float32) * std
    w_sig = jax.random.normal(ks[7], (1, h2), jnp.float32) * std
    bb = 1.0 / jnp.sqrt(jnp.float32(h2))
    b_tanh = jax.random.uniform(ks[8], (1, 1), jnp.float32, -bb, bb)
    b_sig = jax.random.uniform(ks[9], (1, 1), jnp.float32, -bb, bb)
    wh = jnp.concatenate([w_tanh, w_sig], axis=0)   # (2, h2)
    bh = jnp.concatenate([b_tanh, b_sig], axis=0)   # (2, 1)
    return (w0t, b0, w1t, b1, w2t, b2, wh, bh)


def actor_reference(x, params):
    """Pure-JAX reference for the correctness check."""
    (w0t, b0, w1t, b1, w2t, b2, wh, bh) = params
    h = jnp.maximum(x @ w0t + b0, 0.0)
    h = jnp.maximum(h @ w1t + b1, 0.0)
    h = jnp.maximum(h @ w2t + b2, 0.0)
    z = h @ wh.T + bh.T   # (B, 2)
    return jnp.concatenate(
        [jnp.tanh(z[:, 0:1]), jax.nn.sigmoid(z[:, 1:2])], axis=1)


if __name__ == "__main__":
    input_dimension = 16
    hidden_layers = [32, 32, 32]
    batch = 8

    key = jax.random.PRNGKey(0)
    k_x, k_p = jax.random.split(key)
    x = jax.random.normal(k_x, (batch, input_dimension), jnp.float32)
    params = init_actor_params(k_p, input_dimension, hidden_layers)

    out = actor_forward(x, params)
    out = jax.block_until_ready(out)

    ref = actor_reference(x, params)
    assert out.shape == (batch, 2), out.shape
    assert jnp.allclose(out, ref, atol=1e-5, rtol=1e-5), (out, ref)
    print("KERNEL_OK")
</pallas_src>

<mosaic_0001>
module attributes {stable_mosaic.version = 11 : i64} {
  func.func @actor_kernel(%arg0: i32, %arg1: memref<128x16xf32, #tpu.memory_space<vmem>>, %arg2: memref<16x32xf32, #tpu.memory_space<vmem>>, %arg3: memref<1x32xf32, #tpu.memory_space<vmem>>, %arg4: memref<32x32xf32, #tpu.memory_space<vmem>>, %arg5: memref<1x32xf32, #tpu.memory_space<vmem>>, %arg6: memref<32x32xf32, #tpu.memory_space<vmem>>, %arg7: memref<1x32xf32, #tpu.memory_space<vmem>>, %arg8: memref<2x32xf32, #tpu.memory_space<vmem>>, %arg9: memref<2x1xf32, #tpu.memory_space<vmem>>, %arg10: memref<2x128xf32, #tpu.memory_space<vmem>>) attributes {dimension_semantics = [#tpu.dimension_semantics<parallel>], iteration_bounds = array<i64: 1>, scalar_prefetch = 0 : i64, scratch_operands = 0 : i64, tpu.core_type = #tpu.core_type<tc>, window_params = [{transform_indices = @transform_0, window_bounds = array<i64: 128, 16>}, {pipeline_mode = #tpu.pipeline_mode<synchronous>, transform_indices = @transform_1, window_bounds = array<i64: 16, 32>}, {pipeline_mode = #tpu.pipeline_mode<synchronous>, transform_indices = @transform_2, window_bounds = array<i64: 1, 32>}, {pipeline_mode = #tpu.pipeline_mode<synchronous>, transform_indices = @transform_3, window_bounds = array<i64: 32, 32>}, {pipeline_mode = #tpu.pipeline_mode<synchronous>, transform_indices = @transform_4, window_bounds = array<i64: 1, 32>}, {pipeline_mode = #tpu.pipeline_mode<synchronous>, transform_indices = @transform_5, window_bounds = array<i64: 32, 32>}, {pipeline_mode = #tpu.pipeline_mode<synchronous>, transform_indices = @transform_6, window_bounds = array<i64: 1, 32>}, {pipeline_mode = #tpu.pipeline_mode<synchronous>, transform_indices = @transform_7, window_bounds = array<i64: 2, 32>}, {pipeline_mode = #tpu.pipeline_mode<synchronous>, transform_indices = @transform_8, window_bounds = array<i64: 2, 1>}, {transform_indices = @transform_9, window_bounds = array<i64: 2, 128>}]} {
    %c0 = arith.constant 0 : index
    %c0_0 = arith.constant 0 : index
    %0 = vector.load %arg1[%c0, %c0_0] : memref<128x16xf32, #tpu.memory_space<vmem>>, vector<128x16xf32>
    %c0_1 = arith.constant 0 : index
    %c0_2 = arith.constant 0 : index
    %1 = vector.load %arg2[%c0_1, %c0_2] : memref<16x32xf32, #tpu.memory_space<vmem>>, vector<16x32xf32>
    %cst = arith.constant dense<0.000000e+00> : vector<128x32xf32>
    %2 = tpu.matmul %0, %1, %cst {dimension_numbers = #tpu.dot_dimension_numbers<[1], [0], [0], [1], [0, 0, 1, 1], [], []>} : vector<128x16xf32>, vector<16x32xf32>, vector<128x32xf32> -> vector<128x32xf32>
    %c0_3 = arith.constant 0 : index
    %c0_4 = arith.constant 0 : index
    %3 = vector.load %arg3[%c0_3, %c0_4] : memref<1x32xf32, #tpu.memory_space<vmem>>, vector<1x32xf32>
    %4 = vector.broadcast %3 : vector<1x32xf32> to vector<128x32xf32>
    %5 = arith.addf %2, %4 : vector<128x32xf32>
    %cst_5 = arith.constant 0.000000e+00 : f32
    %6 = vector.broadcast %cst_5 : f32 to vector<128x32xf32>
    %7 = arith.maximumf %5, %6 : vector<128x32xf32>
    %c0_6 = arith.constant 0 : index
    %c0_7 = arith.constant 0 : index
    %8 = vector.load %arg4[%c0_6, %c0_7] : memref<32x32xf32, #tpu.memory_space<vmem>>, vector<32x32xf32>
    %cst_8 = arith.constant dense<0.000000e+00> : vector<128x32xf32>
    %9 = tpu.matmul %7, %8, %cst_8 {dimension_numbers = #tpu.dot_dimension_numbers<[1], [0], [0], [1], [0, 0, 1, 1], [], []>} : vector<128x32xf32>, vector<32x32xf32>, vector<128x32xf32> -> vector<128x32xf32>
    %c0_9 = arith.constant 0 : index
    %c0_10 = arith.constant 0 : index
    %10 = vector.load %arg5[%c0_9, %c0_10] : memref<1x32xf32, #tpu.memory_space<vmem>>, vector<1x32xf32>
    %11 = vector.broadcast %10 : vector<1x32xf32> to vector<128x32xf32>
    %12 = arith.addf %9, %11 : vector<128x32xf32>
    %cst_11 = arith.constant 0.000000e+00 : f32
    %13 = vector.broadcast %cst_11 : f32 to vector<128x32xf32>
    %14 = arith.maximumf %12, %13 : vector<128x32xf32>
    %c0_12 = arith.constant 0 : index
    %c0_13 = arith.constant 0 : index
    %15 = vector.load %arg6[%c0_12, %c0_13] : memref<32x32xf32, #tpu.memory_space<vmem>>, vector<32x32xf32>
    %cst_14 = arith.constant dense<0.000000e+00> : vector<128x32xf32>
    %16 = tpu.matmul %14, %15, %cst_14 {dimension_numbers = #tpu.dot_dimension_numbers<[1], [0], [0], [1], [0, 0, 1, 1], [], []>} : vector<128x32xf32>, vector<32x32xf32>, vector<128x32xf32> -> vector<128x32xf32>
    %c0_15 = arith.constant 0 : index
    %c0_16 = arith.constant 0 : index
    %17 = vector.load %arg7[%c0_15, %c0_16] : memref<1x32xf32, #tpu.memory_space<vmem>>, vector<1x32xf32>
    %18 = vector.broadcast %17 : vector<1x32xf32> to vector<128x32xf32>
    %19 = arith.addf %16, %18 : vector<128x32xf32>
    %cst_17 = arith.constant 0.000000e+00 : f32
    %20 = vector.broadcast %cst_17 : f32 to vector<128x32xf32>
    %21 = arith.maximumf %19, %20 : vector<128x32xf32>
    %c0_18 = arith.constant 0 : index
    %c0_19 = arith.constant 0 : index
    %22 = vector.load %arg8[%c0_18, %c0_19] : memref<2x32xf32, #tpu.memory_space<vmem>>, vector<2x32xf32>
    %cst_20 = arith.constant dense<0.000000e+00> : vector<2x128xf32>
    %23 = tpu.matmul %22, %21, %cst_20 {dimension_numbers = #tpu.dot_dimension_numbers<[1], [1], [0], [0], [0, 0, 1, 0], [], []>} : vector<2x32xf32>, vector<128x32xf32>, vector<2x128xf32> -> vector<2x128xf32>
    %c0_21 = arith.constant 0 : index
    %c0_22 = arith.constant 0 : index
    %24 = vector.load %arg9[%c0_21, %c0_22] : memref<2x1xf32, #tpu.memory_space<vmem>>, vector<2x1xf32>
    %25 = vector.broadcast %24 : vector<2x1xf32> to vector<2x128xf32>
    %26 = arith.addf %23, %25 : vector<2x128xf32>
    %27 = tpu.iota {dimensions = array<i32: 0>} : vector<2x128xi32>
    %c0_i32 = arith.constant 0 : i32
    %28 = vector.broadcast %c0_i32 : i32 to vector<2x128xi32>
    %29 = arith.cmpi eq, %27, %28 : vector<2x128xi32>
    %cst_23 = arith.constant 5.000000e-01 : f32
    %30 = vector.broadcast %cst_23 : f32 to vector<2x128xf32>
    %31 = arith.mulf %30, %26 : vector<2x128xf32>
    %32 = arith.select %29, %26, %31 : vector<2x128xi1>, vector<2x128xf32>
    %33 = math.tanh %32 : vector<2x128xf32>
    %cst_24 = arith.constant 5.000000e-01 : f32
    %34 = vector.broadcast %cst_24 : f32 to vector<2x128xf32>
    %35 = arith.mulf %34, %33 : vector<2x128xf32>
    %cst_25 = arith.constant 5.000000e-01 : f32
    %36 = vector.broadcast %cst_25 : f32 to vector<2x128xf32>
    %37 = arith.addf %35, %36 : vector<2x128xf32>
    %38 = arith.select %29, %33, %37 : vector<2x128xi1>, vector<2x128xf32>
    %c0_26 = arith.constant 0 : index
    %c0_27 = arith.constant 0 : index
    %39 = vector.load %arg10[%c0_26, %c0_27] : memref<2x128xf32, #tpu.memory_space<vmem>>, vector<2x128xf32>
    tpu.vector_store %arg10[%c0_26, %c0_27], %38 {strides = array<i32>} : memref<2x128xf32, #tpu.memory_space<vmem>>, vector<2x128xf32>,
    return
  }
  func.func @transform_0(%arg0: i32) -> (i32, i32) {
    %c0_i32 = arith.constant 0 : i32
    %c0_i32_0 = arith.constant 0 : i32
    return %arg0, %c0_i32 : i32, i32
  }
  func.func @transform_1(%arg0: i32) -> (i32, i32) {
    %c0_i32 = arith.constant 0 : i32
    %c0_i32_0 = arith.constant 0 : i32
    %c0_i32_1 = arith.constant 0 : i32
    return %c0_i32, %c0_i32_0 : i32, i32
  }
  func.func @transform_2(%arg0: i32) -> (i32, i32) {
    %c0_i32 = arith.constant 0 : i32
    %c0_i32_0 = arith.constant 0 : i32
    %c0_i32_1 = arith.constant 0 : i32
    return %c0_i32, %c0_i32_0 : i32, i32
  }
  func.func @transform_3(%arg0: i32) -> (i32, i32) {
    %c0_i32 = arith.constant 0 : i32
    %c0_i32_0 = arith.constant 0 : i32
    %c0_i32_1 = arith.constant 0 : i32
    return %c0_i32, %c0_i32_0 : i32, i32
  }
  func.func @transform_4(%arg0: i32) -> (i32, i32) {
    %c0_i32 = arith.constant 0 : i32
    %c0_i32_0 = arith.constant 0 : i32
    %c0_i32_1 = arith.constant 0 : i32
    return %c0_i32, %c0_i32_0 : i32, i32
  }
  func.func @transform_5(%arg0: i32) -> (i32, i32) {
    %c0_i32 = arith.constant 0 : i32
    %c0_i32_0 = arith.constant 0 : i32
    %c0_i32_1 = arith.constant 0 : i32
    return %c0_i32, %c0_i32_0 : i32, i32
  }
  func.func @transform_6(%arg0: i32) -> (i32, i32) {
    %c0_i32 = arith.constant 0 : i32
    %c0_i32_0 = arith.constant 0 : i32
    %c0_i32_1 = arith.constant 0 : i32
    return %c0_i32, %c0_i32_0 : i32, i32
  }
  func.func @transform_7(%arg0: i32) -> (i32, i32) {
    %c0_i32 = arith.constant 0 : i32
    %c0_i32_0 = arith.constant 0 : i32
    %c0_i32_1 = arith.constant 0 : i32
    return %c0_i32, %c0_i32_0 : i32, i32
  }
  func.func @transform_8(%arg0: i32) -> (i32, i32) {
    %c0_i32 = arith.constant 0 : i32
    %c0_i32_0 = arith.constant 0 : i32
    %c0_i32_1 = arith.constant 0 : i32
    return %c0_i32, %c0_i32_0 : i32, i32
  }
  func.func @transform_9(%arg0: i32) -> (i32, i32) {
    %c0_i32 = arith.constant 0 : i32
    %c0_i32_0 = arith.constant 0 : i32
    return %c0_i32, %arg0 : i32, i32
  }
}

</mosaic_0001>

<bundles_post_ra>
// kernel: tpu_custom_call.1
= control target key start
LH: loop header
LB: loop body
LE: loop exit
PB: predicated region body
PF: predicated region fallthrough
CT: control target
= control target key end

     0   :  { %vm58_vm0 = vcmask 130048   ;;  %s1454_s0 = inlined_call_operand.vmem [shape: f32[128,16], index: 0, kind: input, shape index: {}]   ;;  %s1455_s1 = inlined_call_operand.vmem [shape: f32[16,32], index: 1, kind: input, shape index: {}]   ;;  %s1456_s2 = inlined_call_operand.vmem [shape: f32[1,32], index: 2, kind: input, shape index: {}]   ;;  %s1457_s3 = inlined_call_operand.vmem [shape: f32[32,32], index: 3, kind: input, shape index: {}]   ;;  %s1458_s4 = inlined_call_operand.vmem [shape: f32[1,32], index: 4, kind: input, shape index: {}]   ;;  %s1459_s5 = inlined_call_operand.vmem [shape: f32[32,32], index: 5, kind: input, shape index: {}]   ;;  %s1460_s6 = inlined_call_operand.vmem [shape: f32[1,32], index: 6, kind: input, shape index: {}]   ;;  %s1461_s7 = inlined_call_operand.vmem [shape: f32[2,32], index: 7, kind: input, shape index: {}]   ;;  %s1462_s8 = inlined_call_operand.vmem [shape: f32[2,1], index: 8, kind: input, shape index: {}]   ;;  %s1463_s9 = inlined_call_operand.hbm [shape: f32[2,128], index: 9, kind: output, shape index: {}]  }
   0x1   :  { %v49_v0 = vld [vmem:[%s1455_s1] sm:$0xff]  ;;  %v50_v1 = vld [vmem:[%s1455_s1 + $0x8] sm:$0xff]  ;;  %v35_v5 = vld [vmem:[%s1454_s0 + $0x10] sm:$0xff] }
   0x2   :  { %v33_v2 = vld [vmem:[%s1454_s0] sm:$0xff]  ;;  %v1131_v3 = vpack.c.bf16 %v50_v1, %v49_v0  ;;  %v34_v4 = vld [vmem:[%s1454_s0 + $0x8] sm:$0xff] }
   0x3   :  { %1008 = vmatprep.mubr.msk.f32.mxu0 %vm58_vm0, %v33_v2  ;;  %v268_v6 = vld [vmem:[%s1457_s3] sm:$0xff]  ;;  %v269_v7 = vld [vmem:[%s1457_s3 + $0x8] sm:$0xff] }
   0x4   :  { %1132 = vmatprep.subr.bf16.mxu0 %v1131_v3 }
   0x5   :  { %1134 = vmatpush3.bf16.msra.mxu0 %v1131_v3 }
   0x6   :  { %14 = vsyncpa [#allocation3], 0  ;;  %v1135_v8 = vpack.c.bf16 %v269_v7, %v268_v6  ;;  %v36_v9 = vld [vmem:[%s1454_s0 + $0x18] sm:$0xff]  ;;  %v37_v10 = vld [vmem:[%s1454_s0 + $0x20] sm:$0xff]  ;;  %vm279_vm1 = vcmask 261120   ;;  %vm1216_vm2 = vmmov 0  }
   0x7   :  { %v38_v11 = vld [vmem:[%s1454_s0 + $0x28] sm:$0xff]  ;;  %v39_v12 = vld [vmem:[%s1454_s0 + $0x30] sm:$0xff]  ;;  %v40_v13 = vld [vmem:[%s1454_s0 + $0x38] sm:$0xff]  ;;  %s1219_s1 = smov [#allocation2]  }
   0x8   :  { %1009 = vmatmul.mubr.msk.f32.vlgmr.msra.gmra.mrb[0].mxu0 %vm58_vm0, %v34_v4  ;;  %1136 = vmatprep.subr.bf16.mxu1 %v1135_v8  ;;  %v41_v14 = vld [vmem:[%s1454_s0 + $0x40] sm:$0xff]  ;;  %v42_v15 = vld [vmem:[%s1454_s0 + $0x48] sm:$0xff]  ;;  %v43_v16 = vld [vmem:[%s1454_s0 + $0x50] sm:$0xff]  ;;  %s853_s20 = sshll.u32 %s1219_s1, 4  ;;  %s854_s20 = int_to_ptr.vmem [resolvable:$true] %s853_s20 }
   0x9   :  { %1011 = vmatprep.mubr.msk.f32.mxu0 %vm58_vm0, %v35_v5  ;;  %1138 = vmatpush3.bf16.msra.mxu1 %v1135_v8  ;;  %v44_v17 = vld [vmem:[%s1454_s0 + $0x58] sm:$0xff]  ;;  %v45_v18 = vld [vmem:[%s1454_s0 + $0x60] sm:$0xff]  ;;  %v46_v19 = vld [vmem:[%s1454_s0 + $0x68] sm:$0xff]  ;;  %p1196_p1 = scmp.lt.s32.totalorder %s854_s20, %s854_s20 }
   0xa   :  { %v47_v20 = vld [vmem:[%s1454_s0 + $0x70] sm:$0xff]  ;;  %v48_v21 = vld [vmem:[%s1454_s0 + $0x78] sm:$0xff]  ;;  %v489_v25 = vld [vmem:[%s1459_s5] sm:$0xff] }
   0xb   :  { %v270_v22 = vld [vmem:[%s1457_s3 + $0x10] sm:$0xff]  ;;  %v271_v23 = vld [vmem:[%s1457_s3 + $0x18] sm:$0xff]  ;;  %v490_v26 = vld [vmem:[%s1459_s5 + $0x8] sm:$0xff] }
   0xc   :  { %1012 = vmatmul.mubr.msk.f32.gmra.mrb[2].mxu0 %vm58_vm0, %v36_v9  ;;  %v1139_v24 = vpack.c.bf16 %v271_v23, %v270_v22  ;;  %v491_v27 = vld [vmem:[%s1459_s5 + $0x10] sm:$0xff]  ;;  %v1143_v28 = vpack.c.bf16 %v490_v26, %v489_v25  ;;  %v492_v29 = vld [vmem:[%s1459_s5 + $0x18] sm:$0xff]  ;;  %v861_v31 = vld [vmem:[%s1456_s2] ss:$0 sm:$0xff] }
   0xd   :  { %1014 = vmatprep.mubr.msk.f32.mxu0 %vm58_vm0, %v37_v10  ;;  %v1147_v30 = vpack.c.bf16 %v492_v29, %v491_v27  ;;  %vm1411_vm3 = vmpackc.low %vm279_vm1, %vm279_vm1 }
   0xe   :  { %1140 = vmatprep.subr.bf16.mxu1 %v1139_v24  ;;  %1144 = vmatprep.subr.bf16.mxu0 %v1143_v28 }
   0xf   :  { %1142 = vmatpush3.bf16.msra.mxu1 %v1139_v24  ;;  %1146 = vmatpush3.bf16.msra.mxu0 %v1143_v28 }
  0x10   :  { %1015 = vmatmul.mubr.msk.f32.gmra.mrb[4].mxu0 %vm58_vm0, %v38_v11  ;;  %1148 = vmatprep.subr.bf16.mxu0 %v1147_v30 }
  0x11   :  { %1017 = vmatprep.mubr.msk.f32.mxu0 %vm58_vm0, %v39_v12 }
  0x13   :  { %1150 = vmatpush3.bf16.msra.mxu0 %v1147_v30 }
  0x14   :  { %1018 = vmatmul.mubr.msk.f32.gmra.mrb[6].mxu0 %vm58_vm0, %v40_v13 }
  0x15   :  { %1020 = vmatprep.mubr.msk.f32.mxu0 %vm58_vm0, %v41_v14 }
  0x18   :  { %1021 = vmatmul.mubr.msk.f32.gmra.mrb[8].mxu0 %vm58_vm0, %v42_v15 }
  0x19   :  { %1023 = vmatprep.mubr.msk.f32.mxu0 %vm58_vm0, %v43_v16  ;;  %v878_v16 = vld [vmem:[%s1458_s4] ss:$0 sm:$0xff] }
  0x1c   :  { %1024 = vmatmul.mubr.msk.f32.gmra.mrb[10].mxu0 %vm58_vm0, %v44_v17 }
  0x1d   :  { %1026 = vmatprep.mubr.msk.f32.mxu0 %vm58_vm0, %v45_v18 }
  0x20   :  { %1027 = vmatmul.mubr.msk.f32.gmra.mrb[12].mxu0 %vm58_vm0, %v46_v19 }
  0x21   :  { %1029 = vmatprep.mubr.msk.f32.mxu0 %vm58_vm0, %v47_v20 }
  0x24   :  { %1030 = vmatmul.mubr.msk.f32.gmra.mrb[14].mxu0 %vm58_vm0, %v48_v21 }
  0xdb   :  { %v1010_v32 = vpop.f32.mrb[0].mxu0 }
  0xdc   :  { %v179_v33 = vadd.f32 %v1010_v32, %v861_v31  ;;  %v173_v34 = vpop.f32.mrb[1].mxu0 }
  0xdd   :  { %v174_v35 = vadd.f32 %v861_v31, %v173_v34 }
  0xde   :  { %v253_v38 = vmax.f32 %v179_v33, 0.0 }
  0xdf   :  { %v252_v36 = vmax.f32 %v174_v35, 0.0  ;;  %v1013_v37 = vpop.f32.mrb[2].mxu0 }
  0xe0   :  { %v189_v39 = vadd.f32 %v1013_v37, %v861_v31  ;;  %v183_v40 = vpop.f32.mrb[3].mxu0 }
  0xe1   :  { %v184_v41 = vadd.f32 %v861_v31, %v183_v40  ;;  %1040 = vmatprep.mubr.msk.f32.mxu1 %vm279_vm1, %v252_v36 }
  0xe2   :  { %v255_v42 = vmax.f32 %v189_v39, 0.0  ;;  %1041 = vmatmul.mubr.msk.f32.vlgmr.msra.gmra.mrb[0].mxu1 %vm279_vm1, %v253_v38 }
  0xe3   :  { %v254_v43 = vmax.f32 %v184_v41, 0.0  ;;  %v1016_v44 = vpop.f32.mrb[4].mxu0 }
  0xe4   :  { %v199_v45 = vadd.f32 %v1016_v44, %v861_v31  ;;  %v193_v46 = vpop.f32.mrb[5].mxu0 }
  0xe5   :  { %1043 = vmatprep.mubr.msk.f32.mxu1 %vm279_vm1, %v254_v43  ;;  %v194_v47 = vadd.f32 %v861_v31, %v193_v46 }
  0xe6   :  { %v257_v48 = vmax.f32 %v199_v45, 0.0  ;;  %1044 = vmatmul.mubr.msk.f32.gmra.mrb[2].mxu1 %vm279_vm1, %v255_v42 }
  0xe7   :  { %v256_v49 = vmax.f32 %v194_v47, 0.0  ;;  %v1019_v50 = vpop.f32.mrb[6].mxu0 }
  0xe8   :  { %v209_v51 = vadd.f32 %v1019_v50, %v861_v31  ;;  %v203_v52 = vpop.f32.mrb[7].mxu0 }
  0xe9   :  { %1046 = vmatprep.mubr.msk.f32.mxu1 %vm279_vm1, %v256_v49  ;;  %v204_v53 = vadd.f32 %v861_v31, %v203_v52 }
  0xea   :  { %1047 = vmatmul.mubr.msk.f32.gmra.mrb[4].mxu1 %vm279_vm1, %v257_v48  ;;  %v259_v54 = vmax.f32 %v209_v51, 0.0 }
  0xeb   :  { %v258_v55 = vmax.f32 %v204_v53, 0.0  ;;  %v1022_v56 = vpop.f32.mrb[8].mxu0 }
  0xec   :  { %v219_v57 = vadd.f32 %v1022_v56, %v861_v31  ;;  %v213_v58 = vpop.f32.mrb[9].mxu0 }
  0xed   :  { %1049 = vmatprep.mubr.msk.f32.mxu1 %vm279_vm1, %v258_v55  ;;  %v214_v59 = vadd.f32 %v861_v31, %v213_v58 }
  0xee   :  { %1050 = vmatmul.mubr.msk.f32.gmra.mrb[6].mxu1 %vm279_vm1, %v259_v54  ;;  %v261_v60 = vmax.f32 %v219_v57, 0.0 }
  0xef   :  { %v260_v61 = vmax.f32 %v214_v59, 0.0  ;;  %v1025_v62 = vpop.f32.mrb[10].mxu0 }
  0xf0   :  { %v229_v63 = vadd.f32 %v1025_v62, %v861_v31  ;;  %v223_v0 = vpop.f32.mrb[11].mxu0 }
  0xf1   :  { %1052 = vmatprep.mubr.msk.f32.mxu1 %vm279_vm1, %v260_v61  ;;  %v224_v1 = vadd.f32 %v861_v31, %v223_v0 }
  0xf2   :  { %1053 = vmatmul.mubr.msk.f32.gmra.mrb[8].mxu1 %vm279_vm1, %v261_v60  ;;  %v263_v2 = vmax.f32 %v229_v63, 0.0 }
  0xf3   :  { %v262_v3 = vmax.f32 %v224_v1, 0.0  ;;  %v1028_v4 = vpop.f32.mrb[12].mxu0  ;;  %v1215_v1 = vmov 0.0|0.0  }
  0xf4   :  { %v239_v5 = vadd.f32 %v1028_v4, %v861_v31  ;;  %v233_v6 = vpop.f32.mrb[13].mxu0  ;;  %1151 = vmatprep.subr.bf16.mxu1 %v1215_v1  ;;  %v1218_v4 = vmov 0  }
  0xf5   :  { %1055 = vmatprep.mubr.msk.f32.mxu1 %vm279_vm1, %v262_v3  ;;  %v234_v7 = vadd.f32 %v861_v31, %v233_v6  ;;  %v710_v3 = vld [vmem:[%s1462_s8] sm:$0x3]  ;;  %1188 = vset.pattern.permute.xlu0 %v1218_v4 }
  0xf6   :  { %1056 = vmatmul.mubr.msk.f32.gmra.mrb[10].mxu1 %vm279_vm1, %v263_v2  ;;  %v265_v8 = vmax.f32 %v239_v5, 0.0  ;;  %v1217_v2 = vmov 0.0   ;;  %713 = vperm.xlu0 %1188, %v710_v3   ;;  %v895_v5 = vld [vmem:[%s1460_s6] ss:$0 sm:$0xff] }
  0xf7   :  { %v264_v9 = vmax.f32 %v234_v7, 0.0  ;;  %v1031_v10 = vpop.f32.mrb[14].mxu0 }
  0xf8   :  { %v249_v11 = vadd.f32 %v1031_v10, %v861_v31  ;;  %v243_v12 = vpop.f32.mrb[15].mxu0 }
  0xf9   :  { %1058 = vmatprep.mubr.msk.f32.mxu1 %vm279_vm1, %v264_v9  ;;  %v244_v13 = vadd.f32 %v861_v31, %v243_v12 }
  0xfa   :  { %1059 = vmatmul.mubr.msk.f32.gmra.mrb[12].mxu1 %vm279_vm1, %v265_v8  ;;  %v267_v14 = vmax.f32 %v249_v11, 0.0 }
  0xfb   :  { %v266_v15 = vmax.f32 %v244_v13, 0.0 }
  0xfd   :  { %1061 = vmatprep.mubr.msk.f32.mxu1 %vm279_vm1, %v266_v15 }
  0xfe   :  { %1062 = vmatmul.mubr.msk.f32.gmra.mrb[14].mxu1 %vm279_vm1, %v267_v14 }
  0xff   :  { %1128 = vmatprep.mubr.msk.f32.mxu1 %vm1216_vm2, %v1217_v2 }
 0x175   :  { %v714_v2 = vpop.permute.xlu0 %713 }
 0x1b5   :  { %v1042_v17 = vpop.f32.mrb[0].mxu1 }
 0x1b6   :  { %v400_v18 = vadd.f32 %v1042_v17, %v878_v16  ;;  %v394_v19 = vpop.f32.mrb[1].mxu1 }
 0x1b7   :  { %v395_v20 = vadd.f32 %v878_v16, %v394_v19 }
 0x1b8   :  { %v474_v23 = vmax.f32 %v400_v18, 0.0 }
 0x1b9   :  { %v473_v21 = vmax.f32 %v395_v20, 0.0  ;;  %v1045_v22 = vpop.f32.mrb[2].mxu1 }
 0x1ba   :  { %v410_v24 = vadd.f32 %v1045_v22, %v878_v16  ;;  %v404_v25 = vpop.f32.mrb[3].mxu1 }
 0x1bb   :  { %v405_v26 = vadd.f32 %v878_v16, %v404_v25  ;;  %1072 = vmatprep.mubr.msk.f32.mxu0 %vm279_vm1, %v473_v21 }
 0x1bc   :  { %v476_v27 = vmax.f32 %v410_v24, 0.0  ;;  %1073 = vmatmul.mubr.msk.f32.vlgmr.msra.gmra.mrb[16].mxu0 %vm279_vm1, %v474_v23 }
 0x1bd   :  { %v475_v28 = vmax.f32 %v405_v26, 0.0  ;;  %v1048_v29 = vpop.f32.mrb[4].mxu1 }
 0x1be   :  { %v420_v30 = vadd.f32 %v1048_v29, %v878_v16  ;;  %v414_v31 = vpop.f32.mrb[5].mxu1 }
 0x1bf   :  { %1075 = vmatprep.mubr.msk.f32.mxu0 %vm279_vm1, %v475_v28  ;;  %v415_v32 = vadd.f32 %v878_v16, %v414_v31 }
 0x1c0   :  { %v478_v33 = vmax.f32 %v420_v30, 0.0  ;;  %1076 = vmatmul.mubr.msk.f32.gmra.mrb[18].mxu0 %vm279_vm1, %v476_v27 }
 0x1c1   :  { %v477_v34 = vmax.f32 %v415_v32, 0.0  ;;  %v1051_v35 = vpop.f32.mrb[6].mxu1 }
 0x1c2   :  { %v430_v36 = vadd.f32 %v1051_v35, %v878_v16  ;;  %v424_v37 = vpop.f32.mrb[7].mxu1 }
 0x1c3   :  { %1078 = vmatprep.mubr.msk.f32.mxu0 %vm279_vm1, %v477_v34  ;;  %v425_v38 = vadd.f32 %v878_v16, %v424_v37 }
 0x1c4   :  { %1079 = vmatmul.mubr.msk.f32.gmra.mrb[20].mxu0 %vm279_vm1, %v478_v33  ;;  %v480_v39 = vmax.f32 %v430_v36, 0.0 }
 0x1c5   :  { %v479_v40 = vmax.f32 %v425_v38, 0.0  ;;  %v1054_v41 = vpop.f32.mrb[8].mxu1 }
 0x1c6   :  { %v440_v42 = vadd.f32 %v1054_v41, %v878_v16  ;;  %v434_v43 = vpop.f32.mrb[9].mxu1 }
 0x1c7   :  { %1081 = vmatprep.mubr.msk.f32.mxu0 %vm279_vm1, %v479_v40  ;;  %v435_v44 = vadd.f32 %v878_v16, %v434_v43 }
 0x1c8   :  { %1082 = vmatmul.mubr.msk.f32.gmra.mrb[22].mxu0 %vm279_vm1, %v480_v39  ;;  %v482_v45 = vmax.f32 %v440_v42, 0.0 }
 0x1c9   :  { %v481_v46 = vmax.f32 %v435_v44, 0.0  ;;  %v1057_v47 = vpop.f32.mrb[10].mxu1 }
 0x1ca   :  { %v450_v48 = vadd.f32 %v1057_v47, %v878_v16  ;;  %v444_v49 = vpop.f32.mrb[11].mxu1 }
 0x1cb   :  { %1084 = vmatprep.mubr.msk.f32.mxu0 %vm279_vm1, %v481_v46  ;;  %v445_v50 = vadd.f32 %v878_v16, %v444_v49 }
 0x1cc   :  { %1085 = vmatmul.mubr.msk.f32.gmra.mrb[24].mxu0 %vm279_vm1, %v482_v45  ;;  %v484_v51 = vmax.f32 %v450_v48, 0.0 }
 0x1cd   :  { %v483_v52 = vmax.f32 %v445_v50, 0.0  ;;  %v1060_v53 = vpop.f32.mrb[12].mxu1 }
 0x1ce   :  { %v460_v54 = vadd.f32 %v1060_v53, %v878_v16  ;;  %v454_v55 = vpop.f32.mrb[13].mxu1 }
 0x1cf   :  { %1087 = vmatprep.mubr.msk.f32.mxu0 %vm279_vm1, %v483_v52  ;;  %v455_v56 = vadd.f32 %v878_v16, %v454_v55 }
 0x1d0   :  { %1088 = vmatmul.mubr.msk.f32.gmra.mrb[26].mxu0 %vm279_vm1, %v484_v51  ;;  %v486_v57 = vmax.f32 %v460_v54, 0.0 }
 0x1d1   :  { %v485_v58 = vmax.f32 %v455_v56, 0.0  ;;  %v1063_v59 = vpop.f32.mrb[14].mxu1 }
 0x1d2   :  { %v470_v60 = vadd.f32 %v1063_v59, %v878_v16  ;;  %v464_v61 = vpop.f32.mrb[15].mxu1 }
 0x1d3   :  { %1090 = vmatprep.mubr.msk.f32.mxu0 %vm279_vm1, %v485_v58  ;;  %v465_v62 = vadd.f32 %v878_v16, %v464_v61 }
 0x1d4   :  { %1091 = vmatmul.mubr.msk.f32.gmra.mrb[28].mxu0 %vm279_vm1, %v486_v57  ;;  %v488_v63 = vmax.f32 %v470_v60, 0.0 }
 0x1d5   :  { %v487_v0 = vmax.f32 %v465_v62, 0.0 }
 0x1d7   :  { %1093 = vmatprep.mubr.msk.f32.mxu0 %vm279_vm1, %v487_v0  ;;  %v837_v0 = vlaneseq }
 0x1d8   :  { %1094 = vmatmul.mubr.msk.f32.gmra.mrb[30].mxu0 %vm279_vm1, %v488_v63  ;;  %v709_v63 = vld [vmem:[%s1461_s7] sm:$0x3]  ;;  %s1191_s7 = scalar_lea.vmem %s854_s20, 32 }
 0x1d9   :  { %v838_v3 = vshrl.u32 %v837_v0, 7  ;;  %p1192_p0 = scmp.ne.s32.totalorder %s854_s20, %s1191_s7  ;;  %p1197_p2 = scmp.lt.s32.totalorder %s1191_s7, %s1191_s7 }
 0x1db   :  { %vm839_vm4 = vcmp.eq.s32.totalorder %v838_v3, 0  ;;  %p1198_p3 = por %p1197_p2, %p1196_p1 }
 0x1dd   :  { %p1199_p4 = pnand %p1198_p3, %p1192_p0 }
 0x28f   :  { %v1074_v6 = vpop.f32.mrb[16].mxu0 }
 0x290   :  { %v620_v7 = vadd.f32 %v1074_v6, %v895_v5  ;;  %v614_v8 = vpop.f32.mrb[17].mxu0 }
 0x291   :  { %v615_v9 = vadd.f32 %v895_v5, %v614_v8 }
 0x292   :  { %v694_v10 = vmax.f32 %v620_v7, 0.0 }
 0x293   :  { %v693_v11 = vmax.f32 %v615_v9, 0.0  ;;  %v1077_v12 = vpop.f32.mrb[18].mxu0 }
 0x294   :  { %v630_v13 = vadd.f32 %v1077_v12, %v895_v5  ;;  %v624_v14 = vpop.f32.mrb[19].mxu0 }
 0x295   :  { %v1152_v16 = vpack.c.bf16 %v694_v10, %v693_v11  ;;  %v625_v17 = vadd.f32 %v895_v5, %v624_v14 }
 0x296   :  { %v696_v18 = vmax.f32 %v630_v13, 0.0 }
 0x297   :  { %v695_v19 = vmax.f32 %v625_v17, 0.0  ;;  %1154 = vmatpush3.bf16.xpose.msk.msra.mxu1 %vm1411_vm3, %v1152_v16  ;;  %v1080_v20 = vpop.f32.mrb[20].mxu0 }
 0x298   :  { %v640_v21 = vadd.f32 %v1080_v20, %v895_v5  ;;  %v634_v22 = vpop.f32.mrb[21].mxu0  ;;  %1155 = vmatprep.subr.bf16.mxu1 %v1215_v1 }
 0x299   :  { %v1156_v23 = vpack.c.bf16 %v696_v18, %v695_v19  ;;  %v635_v24 = vadd.f32 %v895_v5, %v634_v22 }
 0x29a   :  { %v698_v25 = vmax.f32 %v640_v21, 0.0 }
 0x29b   :  { %v697_v26 = vmax.f32 %v635_v24, 0.0  ;;  %v1083_v27 = vpop.f32.mrb[22].mxu0 }
 0x29c   :  { %v650_v28 = vadd.f32 %v1083_v27, %v895_v5  ;;  %v644_v29 = vpop.f32.mrb[23].mxu0 }
 0x29d   :  { %v1160_v30 = vpack.c.bf16 %v698_v25, %v697_v26  ;;  %v645_v31 = vadd.f32 %v895_v5, %v644_v29 }
 0x29e   :  { %v700_v32 = vmax.f32 %v650_v28, 0.0 }
 0x29f   :  { %1158 = vmatpush3.bf16.xpose.msk.msra.mxu1 %vm1411_vm3, %v1156_v23  ;;  %v699_v33 = vmax.f32 %v645_v31, 0.0  ;;  %v1086_v34 = vpop.f32.mrb[24].mxu0 }
 0x2a0   :  { %1159 = vmatprep.subr.bf16.mxu1 %v1215_v1  ;;  %v660_v35 = vadd.f32 %v1086_v34, %v895_v5  ;;  %v654_v36 = vpop.f32.mrb[25].mxu0 }
 0x2a1   :  { %v1164_v37 = vpack.c.bf16 %v700_v32, %v699_v33  ;;  %v655_v38 = vadd.f32 %v895_v5, %v654_v36 }
 0x2a2   :  { %v702_v39 = vmax.f32 %v660_v35, 0.0 }
 0x2a3   :  { %v701_v40 = vmax.f32 %v655_v38, 0.0  ;;  %v1089_v41 = vpop.f32.mrb[26].mxu0 }
 0x2a4   :  { %v670_v42 = vadd.f32 %v1089_v41, %v895_v5  ;;  %v664_v43 = vpop.f32.mrb[27].mxu0 }
 0x2a5   :  { %v1168_v44 = vpack.c.bf16 %v702_v39, %v701_v40  ;;  %v665_v45 = vadd.f32 %v895_v5, %v664_v43 }
 0x2a6   :  { %v704_v46 = vmax.f32 %v670_v42, 0.0 }
 0x2a7   :  { %1162 = vmatpush3.bf16.xpose.msk.msra.mxu1 %vm1411_vm3, %v1160_v30  ;;  %v703_v47 = vmax.f32 %v665_v45, 0.0  ;;  %v1092_v48 = vpop.f32.mrb[28].mxu0 }
 0x2a8   :  { %1163 = vmatprep.subr.bf16.mxu1 %v1215_v1  ;;  %v680_v49 = vadd.f32 %v1092_v48, %v895_v5  ;;  %v674_v50 = vpop.f32.mrb[29].mxu0 }
 0x2a9   :  { %v1172_v51 = vpack.c.bf16 %v704_v46, %v703_v47  ;;  %v675_v52 = vadd.f32 %v895_v5, %v674_v50 }
 0x2aa   :  { %v706_v53 = vmax.f32 %v680_v49, 0.0 }
 0x2ab   :  { %v705_v54 = vmax.f32 %v675_v52, 0.0  ;;  %v1095_v55 = vpop.f32.mrb[30].mxu0 }
 0x2ac   :  { %v690_v56 = vadd.f32 %v1095_v55, %v895_v5  ;;  %v684_v57 = vpop.f32.mrb[31].mxu0 }
 0x2ad   :  { %v1176_v58 = vpack.c.bf16 %v706_v53, %v705_v54  ;;  %v685_v59 = vadd.f32 %v895_v5, %v684_v57 }
 0x2ae   :  { %v708_v60 = vmax.f32 %v690_v56, 0.0 }
 0x2af   :  { %1166 = vmatpush3.bf16.xpose.msk.msra.mxu1 %vm1411_vm3, %v1164_v37  ;;  %v707_v61 = vmax.f32 %v685_v59, 0.0 }
 0x2b0   :  { %1167 = vmatprep.subr.bf16.mxu1 %v1215_v1 }
 0x2b1   :  { %v1180_v62 = vpack.c.bf16 %v708_v60, %v707_v61 }
 0x2b7   :  { %1170 = vmatpush3.bf16.xpose.msk.msra.mxu1 %vm1411_vm3, %v1168_v44 }
 0x2b8   :  { %1171 = vmatprep.subr.bf16.mxu1 %v1215_v1 }
 0x2bf   :  { %1174 = vmatpush3.bf16.xpose.msk.msra.mxu1 %vm1411_vm3, %v1172_v51 }
 0x2c0   :  { %1175 = vmatprep.subr.bf16.mxu1 %v1215_v1 }
 0x2c7   :  { %1178 = vmatpush3.bf16.xpose.msk.msra.mxu1 %vm1411_vm3, %v1176_v58 }
 0x2c8   :  { %1179 = vmatprep.subr.bf16.mxu1 %v1215_v1 }
 0x2cf   :  { %1182 = vmatpush3.bf16.xpose.msk.msra.mxu1 %vm1411_vm3, %v1180_v62 }
 0x2d6   :  { %1129 = vmatmul.mubr.msk.f32.vlgmr.msra.gmra.mrb[16].mxu1 %vm279_vm1, %v709_v63 }
 0x3a9   :  { %v833_v4 = vpop.f32.mrb[16].mxu1 }
 0x3aa   :  { %v834_v5 = vadd.f32 %v833_v4, %v714_v2  ;;  %v1130_v6 = vpop.f32.mrb[17].mxu1 }
 0x3ac   :  { %v840_v7 = vmul.f32 0.5, %v834_v5 }
 0x3ae   :  { %v841_v8 = vsel %vm839_vm4, %v834_v5, %v840_v7 }
 0x3af   :  { %1189 = vtanh.f32 %v841_v8 }
 0x3b9   :  { %v1190_v1 = vpop.eup %1189 }
 0x3ba   :  { %v843_v9 = vmul.f32 0.5, %v1190_v1 }
 0x3bc   :  { %v844_v10 = vadd.f32 0.5, %v843_v9 }
 0x3be   :  { %v845_v11 = vsel %vm839_vm4, %v1190_v1, %v844_v10 }
 0x3bf   :  { %846 = vst [vmem:[#allocation2] sm:$0x3] %v845_v11 }
 0x3c0   :  { %1202 = shalt.err (!%p1199_p4)
}
 0x3c1   :  { %s1203_s23 = scalar_lea.hbm %s1463_s9, 32 }
 0x3c2   :  { %p1204_p5 = scmp.ne.s32.totalorder %s1463_s9, %s1203_s23  ;;  %p1207_p6 = scmp.lt.u32.totalorder %s1203_s23, %s1463_s9 }
 0x3c4   :  { %p1209_p7 = pnand %p1207_p6, %p1204_p5 }
 0x3c6   :  { %1212 = shalt.err (!%p1209_p7)
}
 0x3c7   :  { %856 = dma.vmem_to_hbm [thread:$0]  %s854_s20, 32, %s1463_s9, [#allocation3]  }
 0x3c8   :  { %1213 = dma.done.wait [#allocation3], 32  }
 0x3c9   :  { %1214 = vsyncadd [#allocation3], 4294967264 }
 0x3ca   :  { %860 = vsyncpa [#allocation3], 1 }

</bundles_post_ra>
